<compile_context>
chip_gen: v7x
topology: tpu7x:2x2x1
jax: 0.10.0
libtpu: 0.0.40
codegen_flags: <defaults>
</compile_context>

<pallas_src>
import functools

import jax
import jax.numpy as jnp
import numpy as np
from jax.experimental import pallas as pl
from jax.experimental.pallas import tpu as pltpu

_LANE = 128      # vreg lane width
_SUBLANE = 8     # f32 sublane tile
_TR_MAX = 512    # max sublane-rows per grid step (~3.9 MiB of VMEM traffic/step)
_N_STATE = 6
_N_ACT = 3
_N_FEAT = _N_STATE + _N_ACT   # packed feature-major input planes


def _rocket_constants(true_model: bool = True):
    """Physical constants from RocketDx.__init__ (no learned weights), pre-folded."""
    mass = 530.4058532714844
    l1 = 2.8466666666666667
    l2 = 2.1350000000000002
    if not true_model:
        l1, l2 = l2, l1
        mass = mass / 2.0
    Ts = 1.0 / 60.0
    g = 9.81
    inertia = 1209.53515625
    return dict(
        Ts=Ts,
        main_engine_thrust=16118.518518518518,
        side_engine_thrust=322.3703703703704,
        max_nozzle_angle=0.2617993877991494,
        # trace-time folded constants (no in-kernel divides)
        Ts_over_m=Ts / mass,
        Ts_g=Ts * g,
        Ts_l1_over_I=Ts * l1 / inertia,
        Ts_l2_over_I=Ts * l2 / inertia,
    )


def _plan_tiles(batch: int):
    """Padded row count, sublane-rows per block and grid length for a batch."""
    rows = pl.cdiv(batch, _LANE)
    rows_p = pl.cdiv(rows, _SUBLANE) * _SUBLANE          # pad only to sublane alignment
    if rows_p <= _TR_MAX:
        if rows_p >= 2 * _SUBLANE:
            # >= 2 grid steps so ("parallel",) can shard across both v7x TCs.
            tr = pl.cdiv(pl.cdiv(rows_p, 2), _SUBLANE) * _SUBLANE
        else:
            tr = rows_p                                   # full extent, single step
    else:
        tr = _TR_MAX
    grid = pl.cdiv(rows_p, tr)                            # partial last block allowed
    return rows_p, tr, grid


def _rocket_dx_kernel(xu_ref, z_ref, *, c):
    # xu_ref: (9, tr, 128) packed [x0..x5, u0..u2]; z_ref: (6, tr, 128).
    # Batch lives on (sublane, lane); each feature plane is a dense vreg tile.
    x0 = xu_ref[0]
    x1 = xu_ref[1]
    x2 = xu_ref[2]
    x3 = xu_ref[3]
    x4 = xu_ref[4]
    x5 = xu_ref[5]

    F_e = jnp.clip(xu_ref[6], 0.0, 1.0) * c["main_engine_thrust"]
    F_s = jnp.clip(xu_ref[7], -1.0, 1.0) * c["side_engine_thrust"]
    phi = jnp.clip(xu_ref[8], -1.0, 1.0) * c["max_nozzle_angle"]

    sin_phi = jnp.sin(phi)
    cos_phi = jnp.cos(phi)
    sin_x4 = jnp.sin(x4)
    cos_x4 = jnp.cos(x4)
    # sin/cos(x4 + phi) via angle addition (VPU) instead of 2 extra EUP calls.
    sin_x4p = sin_x4 * cos_phi + cos_x4 * sin_phi
    cos_x4p = cos_x4 * cos_phi - sin_x4 * sin_phi

    Ts = c["Ts"]
    # Per-feature dense (tr, 128) stores: plain unmasked vst, no concatenate.
    z_ref[0] = x0 + Ts * x2
    z_ref[1] = x1 + Ts * x3
    z_ref[2] = x2 + (F_s * cos_x4 - F_e * sin_x4p) * c["Ts_over_m"]
    z_ref[3] = x3 + (F_e * cos_x4p + F_s * sin_x4) * c["Ts_over_m"] - c["Ts_g"]
    z_ref[4] = x4 + Ts * x5
    z_ref[5] = x5 - F_e * sin_phi * c["Ts_l1_over_I"] - F_s * c["Ts_l2_over_I"]


def _rocket_dx_jax(x, u, true_model: bool):
    """Fused pure-JAX elementwise version (small-batch fast path & VJP backward)."""
    c = _rocket_constants(true_model)
    x = x.astype(jnp.float32)
    u = u.astype(jnp.float32)
    F_e = jnp.clip(u[:, 0], 0.0, 1.0) * c["main_engine_thrust"]
    F_s = jnp.clip(u[:, 1], -1.0, 1.0) * c["side_engine_thrust"]
    phi = jnp.clip(u[:, 2], -1.0, 1.0) * c["max_nozzle_angle"]
    sin_phi = jnp.sin(phi)
    z0 = x[:, 0] + c["Ts"] * x[:, 2]
    z1 = x[:, 1] + c["Ts"] * x[:, 3]
    z2 = x[:, 2] + (F_s * jnp.cos(x[:, 4]) - F_e * jnp.sin(x[:, 4] + phi)) * c["Ts_over_m"]
    z3 = x[:, 3] + (F_e * jnp.cos(x[:, 4] + phi) + F_s * jnp.sin(x[:, 4])) * c["Ts_over_m"] - c["Ts_g"]
    z4 = x[:, 4] + c["Ts"] * x[:, 5]
    z5 = x[:, 5] - F_e * sin_phi * c["Ts_l1_over_I"] - F_s * c["Ts_l2_over_I"]
    return jnp.stack([z0, z1, z2, z3, z4, z5], axis=1)


def _rocket_dx_pallas_impl(x, u, true_model: bool):
    """Pallas path: pack feature-major, run the kernel, unpack."""
    c = _rocket_constants(true_model)
    B = x.shape[0]
    rows_p, tr, grid = _plan_tiles(B)
    Bp = rows_p * _LANE

    # One packed feature-major slab (9, rows_p, 128).  The concat/transpose/
    # pad/reshape is a single relayout pass; allow_input_fusion lets XLA feed
    # it directly into the pallas operand (padded slots stay zero -> safe).
    xu = jnp.concatenate([x.astype(jnp.float32), u.astype(jnp.float32)], axis=1)  # (B, 9)
    xu = jnp.pad(xu.T, ((0, 0), (0, Bp - B))).reshape(_N_FEAT, rows_p, _LANE)

    kernel = functools.partial(_rocket_dx_kernel, c=c)

    zt = pl.pallas_call(
        kernel,
        out_shape=jax.ShapeDtypeStruct((_N_STATE, rows_p, _LANE), jnp.float32),
        grid=(grid,),
        in_specs=[pl.BlockSpec((_N_FEAT, tr, _LANE), lambda i: (0, i, 0))],
        out_specs=pl.BlockSpec((_N_STATE, tr, _LANE), lambda i: (0, i, 0)),
        compiler_params=pltpu.CompilerParams(
            dimension_semantics=("parallel",),
            allow_input_fusion=[True],
        ),
    )(xu)

    # Padded slots compute garbage/zeros but are sliced off here.
    return zt.reshape(_N_STATE, Bp)[:, :B].T.astype(x.dtype)  # (B, 6)


@functools.partial(jax.custom_vjp, nondiff_argnums=(2,))
def _rocket_dx_pallas(x, u, true_model):
    return _rocket_dx_pallas_impl(x, u, true_model)


def _rocket_dx_pallas_fwd(x, u, true_model):
    return _rocket_dx_pallas_impl(x, u, true_model), (x, u)


def _rocket_dx_pallas_bwd(true_model, residuals, g):
    x, u = residuals
    _, vjp = jax.vjp(lambda xx, uu: _rocket_dx_jax(xx, uu, true_model), x, u)
    return vjp(g)


_rocket_dx_pallas.defvjp(_rocket_dx_pallas_fwd, _rocket_dx_pallas_bwd)


@functools.partial(jax.jit, static_argnames=("true_model", "min_pallas_batch"))
def rocket_dx(x, u, true_model: bool = True, min_pallas_batch: int = 2048):
    """Forward pass mirroring RocketDx.forward shape handling.

    For batches below `min_pallas_batch` the fused pure-JAX elementwise version
    runs (launch + relayout would dominate); larger batches use the Pallas
    kernel.  Pass min_pallas_batch=0 to force the Pallas path.
    """
    if x.ndim == 1:
        x = x[None, :]
    if u.ndim == 1:
        u = u[None, :]
    assert x.shape[-1] == _N_STATE and u.shape[-1] == _N_ACT
    B = x.shape[0]
    if B < min_pallas_batch:
        return _rocket_dx_jax(x, u, true_model).astype(x.dtype)
    return _rocket_dx_pallas(x, u, true_model)


def _rocket_dx_ref(x, u, true_model: bool = True):
    """Pure-JAX reference (direct transcription of the PyTorch forward)."""
    mass = 530.4058532714844
    l1 = 2.8466666666666667
    l2 = 2.1350000000000002
    if not true_model:
        l1, l2 = l2, l1
        mass = mass / 2.0
    Ts = 1.0 / 60.0
    g = 9.81
    inertia = 1209.53515625
    main_engine_thrust = 16118.518518518518
    side_engine_thrust = 322.3703703703704
    max_nozzle_angle = 0.2617993877991494

    if x.ndim == 1:
        x = x[None, :]
    if u.ndim == 1:
        u = u[None, :]
    F_e = jnp.clip(u[:, 0], 0.0, 1.0) * main_engine_thrust
    F_s = jnp.clip(u[:, 1], -1.0, 1.0) * side_engine_thrust
    phi = jnp.clip(u[:, 2], -1.0, 1.0) * max_nozzle_angle
    sin_phi = jnp.sin(phi)
    z5 = x[:, 5] + Ts * (-F_e * sin_phi * l1 - l2 * F_s) / inertia
    z2 = x[:, 2] + Ts * (-F_e * jnp.sin(x[:, 4] + phi) + F_s * jnp.cos(x[:, 4])) / mass
    z3 = x[:, 3] + Ts * (F_e * jnp.cos(x[:, 4] + phi) + F_s * jnp.sin(x[:, 4]) - mass * g) / mass
    z0 = x[:, 0] + Ts * x[:, 2]
    z1 = x[:, 1] + Ts * x[:, 3]
    z4 = x[:, 4] + Ts * x[:, 5]
    return jnp.stack([z0, z1, z2, z3, z4, z5], axis=1)


if __name__ == "__main__":
    def _check(B, seed, min_pallas_batch):
        kx, ku = jax.random.split(jax.random.PRNGKey(seed))
        x = jax.random.normal(kx, (B, _N_STATE), dtype=jnp.float32)
        u = jax.random.uniform(ku, (B, _N_ACT), dtype=jnp.float32, minval=-1.5, maxval=1.5)
        z = jax.block_until_ready(
            rocket_dx(x, u, true_model=True, min_pallas_batch=min_pallas_batch))
        z_ref = _rocket_dx_ref(x, u, true_model=True)
        np.testing.assert_allclose(np.asarray(z), np.asarray(z_ref), rtol=1e-5, atol=1e-5)
        return x, u

    # Small batch, forced through the Pallas path (single padded (8,128) plane).
    _check(8, 0, min_pallas_batch=0)
    # Mid batch: multi-lane-row padding, single grid step.
    _check(300, 1, min_pallas_batch=0)
    # Larger batch: rows_p=24, tr=16 -> 2 grid steps with a partial last block.
    x3, u3 = _check(2500, 2, min_pallas_batch=0)
    # Default small-batch fast path (fused pure-JAX elementwise).
    _check(64, 3, min_pallas_batch=2048)

    # Gradients through the Pallas path (custom_vjp backward = fused JAX math).
    loss = lambda xx, uu: rocket_dx(xx, uu, true_model=True, min_pallas_batch=0).sum()
    loss_ref = lambda xx, uu: _rocket_dx_ref(xx, uu, true_model=True).sum()
    gx, gu = jax.grad(loss, argnums=(0, 1))(x3, u3)
    gx_r, gu_r = jax.grad(loss_ref, argnums=(0, 1))(x3, u3)
    np.testing.assert_allclose(np.asarray(gx), np.asarray(gx_r), rtol=1e-5, atol=1e-5)
    np.testing.assert_allclose(np.asarray(gu), np.asarray(gu_r), rtol=1e-4, atol=1e-4)

    print("KERNEL_OK")
</pallas_src>

<mosaic_0001>
module attributes {stable_mosaic.version = 11 : i64} {
  func.func @_rocket_dx_kernel(%arg0: i32, %arg1: memref<9x8x128xf32, #tpu.memory_space<vmem>>, %arg2: memref<6x8x128xf32, #tpu.memory_space<vmem>>) attributes {dimension_semantics = [#tpu.dimension_semantics<parallel>], iteration_bounds = array<i64: 1>, scalar_prefetch = 0 : i64, scratch_operands = 0 : i64, tpu.core_type = #tpu.core_type<tc>, window_params = [{transform_indices = @transform_0, window_bounds = array<i64: 9, 8, 128>}, {transform_indices = @transform_1, window_bounds = array<i64: 6, 8, 128>}]} {
    %c0 = arith.constant 0 : index
    %c0_0 = arith.constant 0 : index
    %c0_1 = arith.constant 0 : index
    %0 = vector.load %arg1[%c0, %c0_0, %c0_1] : memref<9x8x128xf32, #tpu.memory_space<vmem>>, vector<1x8x128xf32>
    %1 = vector.shape_cast %0 : vector<1x8x128xf32> to vector<8x128xf32>
    %c1 = arith.constant 1 : index
    %c0_2 = arith.constant 0 : index
    %c0_3 = arith.constant 0 : index
    %2 = vector.load %arg1[%c1, %c0_2, %c0_3] : memref<9x8x128xf32, #tpu.memory_space<vmem>>, vector<1x8x128xf32>
    %3 = vector.shape_cast %2 : vector<1x8x128xf32> to vector<8x128xf32>
    %c2 = arith.constant 2 : index
    %c0_4 = arith.constant 0 : index
    %c0_5 = arith.constant 0 : index
    %4 = vector.load %arg1[%c2, %c0_4, %c0_5] : memref<9x8x128xf32, #tpu.memory_space<vmem>>, vector<1x8x128xf32>
    %5 = vector.shape_cast %4 : vector<1x8x128xf32> to vector<8x128xf32>
    %c3 = arith.constant 3 : index
    %c0_6 = arith.constant 0 : index
    %c0_7 = arith.constant 0 : index
    %6 = vector.load %arg1[%c3, %c0_6, %c0_7] : memref<9x8x128xf32, #tpu.memory_space<vmem>>, vector<1x8x128xf32>
    %7 = vector.shape_cast %6 : vector<1x8x128xf32> to vector<8x128xf32>
    %c4 = arith.constant 4 : index
    %c0_8 = arith.constant 0 : index
    %c0_9 = arith.constant 0 : index
    %8 = vector.load %arg1[%c4, %c0_8, %c0_9] : memref<9x8x128xf32, #tpu.memory_space<vmem>>, vector<1x8x128xf32>
    %9 = vector.shape_cast %8 : vector<1x8x128xf32> to vector<8x128xf32>
    %c5 = arith.constant 5 : index
    %c0_10 = arith.constant 0 : index
    %c0_11 = arith.constant 0 : index
    %10 = vector.load %arg1[%c5, %c0_10, %c0_11] : memref<9x8x128xf32, #tpu.memory_space<vmem>>, vector<1x8x128xf32>
    %11 = vector.shape_cast %10 : vector<1x8x128xf32> to vector<8x128xf32>
    %c6 = arith.constant 6 : index
    %c0_12 = arith.constant 0 : index
    %c0_13 = arith.constant 0 : index
    %12 = vector.load %arg1[%c6, %c0_12, %c0_13] : memref<9x8x128xf32, #tpu.memory_space<vmem>>, vector<1x8x128xf32>
    %13 = vector.shape_cast %12 : vector<1x8x128xf32> to vector<8x128xf32>
    %cst = arith.constant 0.000000e+00 : f32
    %cst_14 = arith.constant 1.000000e+00 : f32
    %14 = vector.broadcast %cst : f32 to vector<8x128xf32>
    %15 = arith.maximumf %14, %13 : vector<8x128xf32>
    %16 = vector.broadcast %cst_14 : f32 to vector<8x128xf32>
    %17 = arith.minimumf %16, %15 : vector<8x128xf32>
    %cst_15 = arith.constant 16118.5186 : f32
    %18 = vector.broadcast %cst_15 : f32 to vector<8x128xf32>
    %19 = arith.mulf %17, %18 : vector<8x128xf32>
    %c7 = arith.constant 7 : index
    %c0_16 = arith.constant 0 : index
    %c0_17 = arith.constant 0 : index
    %20 = vector.load %arg1[%c7, %c0_16, %c0_17] : memref<9x8x128xf32, #tpu.memory_space<vmem>>, vector<1x8x128xf32>
    %21 = vector.shape_cast %20 : vector<1x8x128xf32> to vector<8x128xf32>
    %cst_18 = arith.constant -1.000000e+00 : f32
    %cst_19 = arith.constant 1.000000e+00 : f32
    %22 = vector.broadcast %cst_18 : f32 to vector<8x128xf32>
    %23 = arith.maximumf %22, %21 : vector<8x128xf32>
    %24 = vector.broadcast %cst_19 : f32 to vector<8x128xf32>
    %25 = arith.minimumf %24, %23 : vector<8x128xf32>
    %cst_20 = arith.constant 322.370361 : f32
    %26 = vector.broadcast %cst_20 : f32 to vector<8x128xf32>
    %27 = arith.mulf %25, %26 : vector<8x128xf32>
    %c8 = arith.constant 8 : index
    %c0_21 = arith.constant 0 : index
    %c0_22 = arith.constant 0 : index
    %28 = vector.load %arg1[%c8, %c0_21, %c0_22] : memref<9x8x128xf32, #tpu.memory_space<vmem>>, vector<1x8x128xf32>
    %29 = vector.shape_cast %28 : vector<1x8x128xf32> to vector<8x128xf32>
    %cst_23 = arith.constant -1.000000e+00 : f32
    %cst_24 = arith.constant 1.000000e+00 : f32
    %30 = vector.broadcast %cst_23 : f32 to vector<8x128xf32>
    %31 = arith.maximumf %30, %29 : vector<8x128xf32>
    %32 = vector.broadcast %cst_24 : f32 to vector<8x128xf32>
    %33 = arith.minimumf %32, %31 : vector<8x128xf32>
    %cst_25 = arith.constant 0.261799395 : f32
    %34 = vector.broadcast %cst_25 : f32 to vector<8x128xf32>
    %35 = arith.mulf %33, %34 : vector<8x128xf32>
    %36 = math.sin %35 : vector<8x128xf32>
    %37 = math.cos %35 : vector<8x128xf32>
    %38 = math.sin %9 : vector<8x128xf32>
    %39 = math.cos %9 : vector<8x128xf32>
    %40 = arith.mulf %38, %37 : vector<8x128xf32>
    %41 = arith.mulf %39, %36 : vector<8x128xf32>
    %42 = arith.addf %40, %41 : vector<8x128xf32>
    %43 = arith.mulf %39, %37 : vector<8x128xf32>
    %44 = arith.mulf %38, %36 : vector<8x128xf32>
    %45 = arith.subf %43, %44 : vector<8x128xf32>
    %cst_26 = arith.constant 0.0166666675 : f32
    %46 = vector.broadcast %cst_26 : f32 to vector<8x128xf32>
    %47 = arith.mulf %46, %5 : vector<8x128xf32>
    %48 = arith.addf %1, %47 : vector<8x128xf32>
    %c0_27 = arith.constant 0 : index
    %c0_28 = arith.constant 0 : index
    %c0_29 = arith.constant 0 : index
    %49 = vector.load %arg2[%c0_27, %c0_28, %c0_29] : memref<6x8x128xf32, #tpu.memory_space<vmem>>, vector<1x8x128xf32>
    %50 = vector.shape_cast %49 : vector<1x8x128xf32> to vector<8x128xf32>
    %51 = vector.shape_cast %48 : vector<8x128xf32> to vector<1x8x128xf32>
    tpu.vector_store %arg2[%c0_27, %c0_28, %c0_29], %51 {strides = array<i32>} : memref<6x8x128xf32, #tpu.memory_space<vmem>>, vector<1x8x128xf32>,
    %cst_30 = arith.constant 0.0166666675 : f32
    %52 = vector.broadcast %cst_30 : f32 to vector<8x128xf32>
    %53 = arith.mulf %52, %7 : vector<8x128xf32>
    %54 = arith.addf %3, %53 : vector<8x128xf32>
    %c1_31 = arith.constant 1 : index
    %c0_32 = arith.constant 0 : index
    %c0_33 = arith.constant 0 : index
    %55 = vector.load %arg2[%c1_31, %c0_32, %c0_33] : memref<6x8x128xf32, #tpu.memory_space<vmem>>, vector<1x8x128xf32>
    %56 = vector.shape_cast %55 : vector<1x8x128xf32> to vector<8x128xf32>
    %57 = vector.shape_cast %54 : vector<8x128xf32> to vector<1x8x128xf32>
    tpu.vector_store %arg2[%c1_31, %c0_32, %c0_33], %57 {strides = array<i32>} : memref<6x8x128xf32, #tpu.memory_space<vmem>>, vector<1x8x128xf32>,
    %58 = arith.mulf %27, %39 : vector<8x128xf32>
    %59 = arith.mulf %19, %42 : vector<8x128xf32>
    %60 = arith.subf %58, %59 : vector<8x128xf32>
    %cst_34 = arith.constant 3.14224781E-5 : f32
    %61 = vector.broadcast %cst_34 : f32 to vector<8x128xf32>
    %62 = arith.mulf %60, %61 : vector<8x128xf32>
    %63 = arith.addf %5, %62 : vector<8x128xf32>
    %c2_35 = arith.constant 2 : index
    %c0_36 = arith.constant 0 : index
    %c0_37 = arith.constant 0 : index
    %64 = vector.load %arg2[%c2_35, %c0_36, %c0_37] : memref<6x8x128xf32, #tpu.memory_space<vmem>>, vector<1x8x128xf32>
    %65 = vector.shape_cast %64 : vector<1x8x128xf32> to vector<8x128xf32>
    %66 = vector.shape_cast %63 : vector<8x128xf32> to vector<1x8x128xf32>
    tpu.vector_store %arg2[%c2_35, %c0_36, %c0_37], %66 {strides = array<i32>} : memref<6x8x128xf32, #tpu.memory_space<vmem>>, vector<1x8x128xf32>,
    %67 = arith.mulf %19, %45 : vector<8x128xf32>
    %68 = arith.mulf %27, %38 : vector<8x128xf32>
    %69 = arith.addf %67, %68 : vector<8x128xf32>
    %cst_38 = arith.constant 3.14224781E-5 : f32
    %70 = vector.broadcast %cst_38 : f32 to vector<8x128xf32>
    %71 = arith.mulf %69, %70 : vector<8x128xf32>
    %72 = arith.addf %7, %71 : vector<8x128xf32>
    %cst_39 = arith.constant 1.635000e-01 : f32
    %73 = vector.broadcast %cst_39 : f32 to vector<8x128xf32>
    %74 = arith.subf %72, %73 : vector<8x128xf32>
    %c3_40 = arith.constant 3 : index
    %c0_41 = arith.constant 0 : index
    %c0_42 = arith.constant 0 : index
    %75 = vector.load %arg2[%c3_40, %c0_41, %c0_42] : memref<6x8x128xf32, #tpu.memory_space<vmem>>, vector<1x8x128xf32>
    %76 = vector.shape_cast %75 : vector<1x8x128xf32> to vector<8x128xf32>
    %77 = vector.shape_cast %74 : vector<8x128xf32> to vector<1x8x128xf32>
    tpu.vector_store %arg2[%c3_40, %c0_41, %c0_42], %77 {strides = array<i32>} : memref<6x8x128xf32, #tpu.memory_space<vmem>>, vector<1x8x128xf32>,
    %cst_43 = arith.constant 0.0166666675 : f32
    %78 = vector.broadcast %cst_43 : f32 to vector<8x128xf32>
    %79 = arith.mulf %78, %11 : vector<8x128xf32>
    %80 = arith.addf %9, %79 : vector<8x128xf32>
    %c4_44 = arith.constant 4 : index
    %c0_45 = arith.constant 0 : index
    %c0_46 = arith.constant 0 : index
    %81 = vector.load %arg2[%c4_44, %c0_45, %c0_46] : memref<6x8x128xf32, #tpu.memory_space<vmem>>, vector<1x8x128xf32>
    %82 = vector.shape_cast %81 : vector<1x8x128xf32> to vector<8x128xf32>
    %83 = vector.shape_cast %80 : vector<8x128xf32> to vector<1x8x128xf32>
    tpu.vector_store %arg2[%c4_44, %c0_45, %c0_46], %83 {strides = array<i32>} : memref<6x8x128xf32, #tpu.memory_space<vmem>>, vector<1x8x128xf32>,
    %84 = arith.mulf %19, %36 : vector<8x128xf32>
    %cst_47 = arith.constant 3.92253532E-5 : f32
    %85 = vector.broadcast %cst_47 : f32 to vector<8x128xf32>
    %86 = arith.mulf %84, %85 : vector<8x128xf32>
    %87 = arith.subf %11, %86 : vector<8x128xf32>
    %cst_48 = arith.constant 2.94190158E-5 : f32
    %88 = vector.broadcast %cst_48 : f32 to vector<8x128xf32>
    %89 = arith.mulf %27, %88 : vector<8x128xf32>
    %90 = arith.subf %87, %89 : vector<8x128xf32>
    %c5_49 = arith.constant 5 : index
    %c0_50 = arith.constant 0 : index
    %c0_51 = arith.constant 0 : index
    %91 = vector.load %arg2[%c5_49, %c0_50, %c0_51] : memref<6x8x128xf32, #tpu.memory_space<vmem>>, vector<1x8x128xf32>
    %92 = vector.shape_cast %91 : vector<1x8x128xf32> to vector<8x128xf32>
    %93 = vector.shape_cast %90 : vector<8x128xf32> to vector<1x8x128xf32>
    tpu.vector_store %arg2[%c5_49, %c0_50, %c0_51], %93 {strides = array<i32>} : memref<6x8x128xf32, #tpu.memory_space<vmem>>, vector<1x8x128xf32>,
    return
  }
  func.func @transform_0(%arg0: i32) -> (i32, i32, i32) {
    %c0_i32 = arith.constant 0 : i32
    %c0_i32_0 = arith.constant 0 : i32
    %c0_i32_1 = arith.constant 0 : i32
    return %c0_i32, %arg0, %c0_i32_0 : i32, i32, i32
  }
  func.func @transform_1(%arg0: i32) -> (i32, i32, i32) {
    %c0_i32 = arith.constant 0 : i32
    %c0_i32_0 = arith.constant 0 : i32
    %c0_i32_1 = arith.constant 0 : i32
    return %c0_i32, %arg0, %c0_i32_0 : i32, i32, i32
  }
}

</mosaic_0001>

<bundles_post_ra>
// kernel: rocket_dx.1
= control target key start
LH: loop header
LB: loop body
LE: loop exit
PB: predicated region body
PF: predicated region fallthrough
CT: control target
= control target key end

     0   :  { %v545_v37 = vmov 683565275   ;;  %v546_v39 = vmov 2475754826   ;;  %v547_v44 = vmov 2131351028   ;;  %s700_s0 = inlined_call_operand.vmem [shape: f32[9,8,128], index: 0, kind: input, shape index: {}]   ;;  %s701_s1 = inlined_call_operand.vmem [shape: f32[6,8,128], index: 1, kind: output, shape index: {}]  }
   0x1   :  { %v8_v0 = vld [vmem:[%s700_s0] sm:$0xff]  ;;  %v567_v1 = vld [vmem:[%s700_s0 + $0x10] sm:$0xff]  ;;  %v491_v3 = vld [vmem:[%s700_s0 + $0x8] sm:$0xff]  ;;  %v548_v46 = vmov 2102212464  }
   0x2   :  { %v454_v2 = vmul.f32 0.016666668, %v567_v1  ;;  %v576_v4 = vld [vmem:[%s700_s0 + $0x18] sm:$0xff]  ;;  %v582_v6 = vld [vmem:[%s700_s0 + $0x20] sm:$0xff]  ;;  %v596_v13 = vld [vmem:[%s700_s0 + $0x28] sm:$0xff] }
   0x3   :  { %v457_v5 = vmul.f32 0.016666668, %v576_v4  ;;  %v499_v7 = vld [vmem:[%s700_s0 + $0x40] sm:$0xff]  ;;  %v244_v12 = vand.u32 2139095040, %v582_v6  ;;  %v476_v17 = vmul.f32 0.016666668, %v596_v13 }
   0x4   :  { %v455_v8 = vadd.f32 %v454_v2, %v8_v0  ;;  %v500_v9 = vclamps-f32 %v499_v7, 1.0  ;;  %v241_v20 = vand.u32 2147483647, %v582_v6  ;;  %v549_v48 = vmov 920167782  }
   0x5   :  { %v458_v10 = vadd.f32 %v491_v3, %v457_v5  ;;  %v245_v16 = vshrl.u32 %v244_v12, 23  ;;  %v477_v22 = vadd.f32 %v582_v6, %v476_v17  ;;  %v550_v56 = vmov 1326507024  }
   0x6   :  { %456 = vst [vmem:[%s701_s1] sm:$0xff] %v455_v8  ;;  %v590_v11 = vmul.f32 0.2617994, %v500_v9  ;;  %v613_v27 = vand.u32 8388607, %v241_v20 }
   0x7   :  { %517 = vst [vmem:[%s701_s1 + $0x8] sm:$0xff] %v458_v10  ;;  %v509_v21 = vadd.s32 4294967169, %v245_v16  ;;  %521 = vst [vmem:[%s701_s1 + $0x20] sm:$0xff] %v477_v22 }
   0x8   :  { %v34_v14 = vand.u32 2147483647, %v590_v11  ;;  %v37_v15 = vand.u32 2139095040, %v590_v11  ;;  %v249_v34 = vor.u32 8388608, %v613_v27  ;;  %vm36_vm14 = vcmp.lt.s32.totalorder %v590_v11, 0 }
   0x9   :  { %v251_v24 = vadd.s32 1, %v509_v21 }
   0xa   :  { %v38_v18 = vshrl.u32 %v37_v15, 23  ;;  %v41_v19 = vand.u32 8388607, %v34_v14  ;;  %vm35_vm15 = vcmp.le.f32.partialorder %v34_v14, 0.7853982  ;;  %v496_v14 = vld [vmem:[%s700_s0 + $0x30] sm:$0xff] }
   0xb   :  { %vm252_vm0 = vcmp.gt.s32.totalorder %v251_v24, 0 }
   0xc   :  { %v501_v23 = vadd.s32 4294967169, %v38_v18  ;;  %v42_v25 = vor.u32 8388608, %v41_v19  ;;  %v253_v28 = vsel %vm252_vm0, %v251_v24, 0  ;;  %vm243_vm0 = vcmp.lt.s32.totalorder %v582_v6, 0 }
   0xd   :  { %v255_v30 = vand.u32 31, %v253_v28  ;;  %v618_v35 = vshrl.u32 %v253_v28, 5 }
   0xe   :  { %v44_v26 = vadd.s32 1, %v501_v23  ;;  %v615_v33 = vshll.u32 %v42_v25, 8 }
   0xf   :  { %v256_v36 = vsub.s32 32, %v255_v30  ;;  %v258_v38 = vshll.u32 %v545_v37, %v255_v30  ;;  %v261_v40 = vshll.u32 %v546_v39, %v255_v30  ;;  %v264_v50 = vshll.u32 %v547_v44, %v255_v30 }
  0x10   :  { %vm45_vm1 = vcmp.gt.s32.totalorder %v44_v26, 0  ;;  %vm273_vm6 = vcmp.lt.s32.totalorder %v618_v35, 1  ;;  %vm274_vm7 = vcmp.lt.s32.totalorder %v618_v35, 2  ;;  %vm275_vm8 = vcmp.lt.s32.totalorder %v618_v35, 3 }
  0x11   :  { %v46_v29 = vsel %vm45_vm1, %v44_v26, 0  ;;  %v259_v63 = vshrl.u32 %v546_v39, %v256_v36  ;;  %v262_v0 = vshrl.u32 %v547_v44, %v256_v36  ;;  %v257_v12 = vshrl.u32 %v545_v37, %v256_v36 }
  0x12   :  { %v47_v31 = vshrl.u32 %v46_v29, 5  ;;  %v48_v32 = vand.u32 31, %v46_v29  ;;  %v265_v23 = vshrl.u32 %v548_v46, %v256_v36  ;;  %v267_v29 = vshll.u32 %v548_v46, %v255_v30 }
  0x13   :  { %v260_v18 = vor.u32 %v259_v63, %v258_v38  ;;  %v263_v22 = vor.u32 %v262_v0, %v261_v40  ;;  %vm276_vm9 = vcmp.lt.s32.totalorder %v618_v35, 4  ;;  %vm242_vm1 = vcmp.le.f32.partialorder %v241_v20, 0.7853982 }
  0x14   :  { %v49_v41 = vsub.s32 32, %v48_v32  ;;  %v51_v42 = vshll.u32 %v545_v37, %v48_v32  ;;  %v54_v43 = vshll.u32 %v546_v39, %v48_v32  ;;  %v57_v45 = vshll.u32 %v547_v44, %v48_v32 }
  0x15   :  { %v60_v47 = vshll.u32 %v548_v46, %v48_v32  ;;  %v63_v49 = vshll.u32 %v549_v48, %v48_v32  ;;  %vm66_vm2 = vcmp.lt.s32.totalorder %v47_v31, 1  ;;  %vm67_vm3 = vcmp.lt.s32.totalorder %v47_v31, 2 }
  0x16   :  { %v50_v51 = vshrl.u32 %v545_v37, %v49_v41  ;;  %v52_v52 = vshrl.u32 %v546_v39, %v49_v41  ;;  %v55_v53 = vshrl.u32 %v547_v44, %v49_v41  ;;  %v58_v54 = vshrl.u32 %v548_v46, %v49_v41 }
  0x17   :  { %v61_v55 = vshrl.u32 %v549_v48, %v49_v41  ;;  %v64_v57 = vshrl.u32 %v550_v56, %v49_v41  ;;  %vm68_vm4 = vcmp.lt.s32.totalorder %v47_v31, 3  ;;  %vm69_vm5 = vcmp.lt.s32.totalorder %v47_v31, 4 }
  0x18   :  { %v53_v58 = vor.u32 %v52_v52, %v51_v42  ;;  %v56_v59 = vor.u32 %v55_v53, %v54_v43  ;;  %v59_v60 = vor.u32 %v58_v54, %v57_v45  ;;  %v266_v28 = vor.u32 %v265_v23, %v264_v50 }
  0x19   :  { %v62_v61 = vor.u32 %v61_v55, %v60_v47  ;;  %v65_v62 = vor.u32 %v64_v57, %v63_v49  ;;  %v268_v32 = vshrl.u32 %v549_v48, %v256_v36  ;;  %v270_v37 = vshll.u32 %v549_v48, %v255_v30 }
  0x1a   :  { %v70_v2 = vsel %vm66_vm2, %v50_v51, %v53_v58  ;;  %v71_v3 = vsel %vm69_vm5, %v59_v60, 2102212464  ;;  %v74_v5 = vsel %vm66_vm2, %v53_v58, %v56_v59  ;;  %v78_v7 = vsel %vm66_vm2, %v56_v59, %v59_v60 }
  0x1b   :  { %v72_v8 = vsel %vm68_vm4, %v56_v59, %v71_v3  ;;  %v75_v9 = vsel %vm69_vm5, %v62_v61, 920167782  ;;  %v79_v10 = vsel %vm69_vm5, %v65_v62, 1326507024  ;;  %v271_v39 = vshrl.u32 %v550_v56, %v256_v36 }
  0x1c   :  { %v73_v15 = vsel %vm67_vm3, %v70_v2, %v72_v8  ;;  %v76_v16 = vsel %vm68_vm4, %v59_v60, %v75_v9  ;;  %v80_v17 = vsel %vm68_vm4, %v62_v61, %v79_v10  ;;  %v289_v31 = vshll.u32 %v249_v34, 8 }
  0x1d   :  { %v77_v19 = vsel %vm67_vm3, %v74_v5, %v76_v16  ;;  %v81_v21 = vsel %vm67_vm3, %v78_v7, %v80_v17  ;;  %v89_v38 = vmul.u32 %v615_v33, %v73_v15  ;;  %v269_v40 = vor.u32 %v268_v32, %v267_v29 }
  0x1e   :  { %v630_v24 = vmul.u32.u64.low %v615_v33, %v81_v21  ;;  %v631_v25 = vmul.u32.u64.high %v615_v33, %v81_v21, %v630_v24  ;;  %v634_v26 = vmul.u32.u64.low %v615_v33, %v77_v19  ;;  %v635_v27 = vmul.u32.u64.high %v615_v33, %v77_v19, %v634_v26 }
  0x1f   :  { %v272_v42 = vor.u32 %v271_v39, %v270_v37  ;;  %v281_v43 = vsel %vm273_vm6, %v260_v18, %v263_v22  ;;  %v277_v30 = vsel %vm273_vm6, %v257_v12, %v260_v18  ;;  %v278_v44 = vsel %vm276_vm9, %v266_v28, 2102212464 }
  0x20   :  { %vm91_vm10 = vc.u32 %v631_v25, %v634_v26  ;;  %v92_v41 = vadd.s32 1, %v635_v27  ;;  %v282_v33 = vsel %vm276_vm9, %v269_v40, 920167782  ;;  %v285_v36 = vsel %vm273_vm6, %v263_v22, %v266_v28 }
  0x21   :  { %v279_v34 = vsel %vm275_vm8, %v263_v22, %v278_v44  ;;  %v283_v46 = vsel %vm275_vm8, %v266_v28, %v282_v33  ;;  %v286_v47 = vsel %vm276_vm9, %v272_v42, 1326507024  ;;  %v90_v12 = vadd.s32 %v634_v26, %v631_v25 }
  0x22   :  { %v93_v45 = vsel %vm91_vm10, %v92_v41, %v635_v27  ;;  %v284_v49 = vsel %vm274_vm7, %v281_v43, %v283_v46  ;;  %v287_v50 = vsel %vm275_vm8, %v269_v40, %v286_v47  ;;  %v280_v51 = vsel %vm274_vm7, %v277_v30, %v279_v34 }
  0x23   :  { %v94_v48 = vadd.s32 %v93_v45, %v89_v38  ;;  %v288_v52 = vsel %vm274_vm7, %v285_v36, %v287_v50  ;;  %v657_v53 = vmul.u32.u64.low %v289_v31, %v284_v49  ;;  %v658_v54 = vmul.u32.u64.high %v289_v31, %v284_v49, %v657_v53 }
  0x24   :  { %v660_v56 = vmul.u32.u64.low %v289_v31, %v288_v52  ;;  %v661_v57 = vmul.u32.u64.high %v289_v31, %v288_v52, %v660_v56  ;;  %v296_v59 = vmul.u32 %v289_v31, %v280_v51  ;;  %vm126_vm5 = vweird.f32 %v590_v11 }
  0x25   :  { %v95_v55 = vadd.s32 536870912, %v94_v48  ;;  %v299_v60 = vadd.s32 1, %v658_v54 }
  0x26   :  { %vm298_vm11 = vc.u32 %v661_v57, %v657_v53  ;;  %v297_v38 = vadd.s32 %v657_v53, %v661_v57  ;;  %v21_v57 = vmax.f32 %v496_v14, 0.0 }
  0x27   :  { %v96_v58 = vshrl.u32 %v95_v55, 30  ;;  %v300_v62 = vsel %vm298_vm11, %v299_v60, %v658_v54 }
  0x28   :  { %v301_v0 = vadd.s32 %v300_v62, %v296_v59 }
  0x29   :  { %v97_v61 = vshll.u32 %v96_v58, 30  ;;  %v120_v25 = vsub.s32 4, %v96_v58 }
  0x2a   :  { %v302_v2 = vadd.s32 536870912, %v301_v0 }
  0x2b   :  { %v98_v63 = vsub.s32 %v94_v48, %v97_v61  ;;  %v121_v33 = vsel %vm36_vm14, %v120_v25, %v96_v58  ;;  %v497_v61 = vld [vmem:[%s700_s0 + $0x38] sm:$0xff] }
  0x2c   :  { %v303_v5 = vshrl.u32 %v302_v2, 30  ;;  %v123_v47 = vsel %vm35_vm15, 0, %v121_v33 }
  0x2d   :  { %v100_v35 = vsub.s32 0, %v98_v63  ;;  %v127_v52 = vadd.s32 3, %v123_v47 }
  0x2e   :  { %v304_v8 = vshll.u32 %v303_v5, 30  ;;  %v327_v51 = vsub.s32 4, %v303_v5 }
  0x2f   :  { %v502_v3 = vmin.u32 %v100_v35, %v98_v63  ;;  %v128_v56 = vand.u32 3, %v127_v52  ;;  %v22_v35 = vmin.f32 %v21_v57, 1.0 }
  0x30   :  { %v305_v10 = vsub.s32 %v301_v0, %v304_v8  ;;  %v328_v55 = vsel %vm243_vm0, %v327_v51, %v303_v5 }
  0x31   :  { %v102_v7 = vclz %v502_v3  ;;  %v330_v60 = vsel %vm242_vm1, 0, %v328_v55  ;;  %vm133_vm2 = vcmp.eq.s32.totalorder %v128_v56, 2  ;;  %vm130_vm3 = vcmp.eq.s32.totalorder %v128_v56, 0 }
  0x32   :  { %v307_v16 = vsub.s32 0, %v305_v10  ;;  %v334_v2 = vadd.s32 3, %v330_v60  ;;  %v498_v3 = vclamps-f32 %v497_v61, 1.0  ;;  %vm129_vm4 = vcmp.lt.s32.totalorder %v128_v56, 2 }
  0x33   :  { %v503_v9 = vadd.s32 4294967294, %v102_v7 }
  0x34   :  { %v510_v21 = vmin.u32 %v307_v16, %v305_v10  ;;  %v28_v16 = vmul.f32 322.37036, %v498_v3 }
  0x35   :  { %vm504_vm12 = vcmp.lt.s32.totalorder %v503_v9, 0 }
  0x36   :  { %v105_v15 = vsel %vm504_vm12, 0, %v503_v9  ;;  %v309_v24 = vclz %v510_v21  ;;  %v23_v9 = vmul.f32 16118.519, %v22_v35 }
  0x37   :  { %v106_v17 = vsub.s32 32, %v105_v15  ;;  %v107_v18 = vshll.u32 %v98_v63, %v105_v15  ;;  %v110_v19 = vsub.s32 4294967266, %v105_v15  ;;  %v231_v63 = vand.u32 3, %v123_v47 }
  0x38   :  { %v511_v29 = vadd.s32 4294967294, %v309_v24  ;;  %v438_v15 = vand.u32 3, %v330_v60  ;;  %v483_v24 = vmul.f32 2.9419016e-05, %v28_v16 }
  0x39   :  { %v108_v22 = vshrl.u32 %v90_v12, %v106_v17  ;;  %v111_v23 = vadd.s32 127, %v110_v19  ;;  %vm233_vm6 = vcmp.eq.s32.totalorder %v231_v63, 0  ;;  %vm236_vm7 = vcmp.eq.s32.totalorder %v231_v63, 2 }
  0x3a   :  { %vm512_vm13 = vcmp.lt.s32.totalorder %v511_v29, 0  ;;  %v335_v12 = vand.u32 3, %v334_v2  ;;  %vm232_vm8 = vcmp.lt.s32.totalorder %v231_v63, 2  ;;  %vm443_vm10 = vcmp.eq.s32.totalorder %v438_v15, 2 }
  0x3b   :  { %v109_v27 = vor.u32 %v108_v22, %v107_v18  ;;  %v112_v28 = vshll.u32 %v111_v23, 23  ;;  %v312_v26 = vsel %vm512_vm13, 0, %v511_v29  ;;  %vm440_vm12 = vcmp.eq.s32.totalorder %v438_v15, 0 }
  0x3c   :  { %v313_v31 = vsub.s32 32, %v312_v26  ;;  %v314_v40 = vshll.u32 %v305_v10, %v312_v26  ;;  %v317_v41 = vsub.s32 4294967266, %v312_v26  ;;  %vm340_vm9 = vcmp.eq.s32.totalorder %v335_v12, 2 }
  0x3d   :  { %v113_v32 = vor.u32 4788187, %v112_v28  ;;  %v116_v37 = vcvt.s32.f32 %v109_v27  ;;  %vm337_vm11 = vcmp.eq.s32.totalorder %v335_v12, 0  ;;  %vm336_vm13 = vcmp.lt.s32.totalorder %v335_v12, 2 }
  0x3e   :  { %v315_v43 = vshrl.u32 %v297_v38, %v313_v31  ;;  %v318_v30 = vadd.s32 127, %v317_v41 }
  0x3f   :  { %v114_v39 = vand.u32 2147483647, %v113_v32 }
  0x40   :  { %v316_v36 = vor.u32 %v315_v43, %v314_v40  ;;  %v319_v45 = vshll.u32 %v318_v30, 23 }
  0x41   :  { %v117_v42 = vmul.f32 %v116_v37, %v114_v39 }
  0x42   :  { %v320_v48 = vor.u32 4788187, %v319_v45  ;;  %v323_v49 = vcvt.s32.f32 %v316_v36 }
  0x43   :  { %v118_v44 = vxor.u32 2147483648, %v117_v42 }
  0x44   :  { %v321_v50 = vand.u32 2147483647, %v320_v48 }
  0x45   :  { %v119_v34 = vsel %vm36_vm14, %v118_v44, %v117_v42  ;;  %vm439_vm14 = vcmp.lt.s32.totalorder %v438_v15, 2 }
  0x46   :  { %v122_v46 = vsel %vm35_vm15, %v590_v11, %v119_v34  ;;  %v324_v53 = vmul.f32 %v323_v49, %v321_v50  ;;  %vm333_vm15 = vweird.f32 %v582_v6 }
  0x47   :  { %537 = vcosq.f32 %v122_v46 }
  0x48   :  { %539 = vsinq.f32 %v122_v46  ;;  %v325_v54 = vxor.u32 2147483648, %v324_v53 }
  0x4a   :  { %v326_v58 = vsel %vm243_vm0, %v325_v54, %v324_v53 }
  0x4b   :  { %v329_v59 = vsel %vm242_vm1, %v582_v6, %v326_v58 }
  0x4c   :  { %541 = vcosq.f32 %v329_v59 }
  0x4d   :  { %543 = vsinq.f32 %v329_v59 }
  0x51   :  { %v538_v62 = vpop.eup %537 }
  0x52   :  { %v540_v0 = vpop.eup %539  ;;  %v134_v20 = vxor.u32 2147483648, %v538_v62 }
  0x53   :  { %v131_v5 = vxor.u32 2147483648, %v540_v0 }
  0x54   :  { %v135_v7 = vsel %vm133_vm2, %v134_v20, %v540_v0  ;;  %v238_v19 = vsel %vm236_vm7, %v134_v20, %v540_v0 }
  0x55   :  { %v132_v8 = vsel %vm130_vm3, %v538_v62, %v131_v5  ;;  %v235_v18 = vsel %vm233_vm6, %v538_v62, %v131_v5 }
  0x56   :  { %v136_v10 = vsel %vm129_vm4, %v132_v8, %v135_v7  ;;  %v542_v22 = vpop.eup %541  ;;  %v239_v28 = vsel %vm232_vm8, %v235_v18, %v238_v19 }
  0x57   :  { %v137_v17 = vsel %vm126_vm5, nan, %v136_v10  ;;  %v544_v27 = vpop.eup %543  ;;  %v341_v29 = vxor.u32 2147483648, %v542_v22  ;;  %v240_v25 = vsel %vm126_vm5, nan, %v239_v28 }
  0x58   :  { %v480_v21 = vmul.f32 %v137_v17, %v23_v9  ;;  %v338_v32 = vxor.u32 2147483648, %v544_v27 }
  0x59   :  { %v342_v38 = vsel %vm340_vm9, %v341_v29, %v544_v27  ;;  %v445_v39 = vsel %vm443_vm10, %v341_v29, %v544_v27 }
  0x5a   :  { %v481_v23 = vmul.f32 3.9225353e-05, %v480_v21  ;;  %v339_v26 = vsel %vm337_vm11, %v542_v22, %v338_v32  ;;  %v442_v31 = vsel %vm440_vm12, %v542_v22, %v338_v32 }
  0x5b   :  { %v343_v41 = vsel %vm336_vm13, %v339_v26, %v342_v38  ;;  %v446_v42 = vsel %vm439_vm14, %v442_v31, %v445_v39 }
  0x5c   :  { %v482_v37 = vsub.f32 %v596_v13, %v481_v23  ;;  %v344_v43 = vsel %vm333_vm15, nan, %v343_v41  ;;  %v447_v30 = vsel %vm333_vm15, nan, %v446_v42 }
  0x5d   :  { %v448_v44 = vmul.f32 %v344_v43, %v240_v25  ;;  %v449_v13 = vmul.f32 %v447_v30, %v137_v17  ;;  %v451_v33 = vmul.f32 %v447_v30, %v240_v25  ;;  %v452_v6 = vmul.f32 %v344_v43, %v137_v17 }
  0x5e   :  { %v484_v40 = vsub.f32 %v482_v37, %v483_v24  ;;  %v461_v45 = vmul.f32 %v447_v30, %v28_v16  ;;  %v469_v11 = vmul.f32 %v344_v43, %v28_v16 }
  0x5f   :  { %v450_v36 = vadd.f32 %v449_v13, %v448_v44  ;;  %v453_v34 = vsub.f32 %v451_v33, %v452_v6 }
  0x60   :  { %522 = vst [vmem:[%s701_s1 + $0x28] sm:$0xff] %v484_v40 }
  0x61   :  { %v462_v46 = vmul.f32 %v450_v36, %v23_v9  ;;  %v468_v47 = vmul.f32 %v453_v34, %v23_v9 }
  0x63   :  { %v463_v48 = vsub.f32 %v461_v45, %v462_v46  ;;  %v470_v49 = vadd.f32 %v469_v11, %v468_v47 }
  0x65   :  { %v464_v50 = vmul.f32 3.1422478e-05, %v463_v48  ;;  %v471_v51 = vmul.f32 3.1422478e-05, %v470_v49 }
  0x67   :  { %v465_v52 = vadd.f32 %v567_v1, %v464_v50  ;;  %v472_v53 = vadd.f32 %v576_v4, %v471_v51 }
  0x69   :  { %518 = vst [vmem:[%s701_s1 + $0x10] sm:$0xff] %v465_v52  ;;  %v519_v14 = vadd.f32 -0.1635, %v472_v53 }
  0x6b   :  { %520 = vst [vmem:[%s701_s1 + $0x18] sm:$0xff] %v519_v14 }

</bundles_post_ra>
